<compile_context>
chip_gen: v6e
topology: v6e:2x2x1
jax: 0.10.0
libtpu: 0.0.40
codegen_flags: <defaults>
</compile_context>

<pallas_src>
import functools

import jax
import jax.numpy as jnp
from jax import lax
from jax.experimental import pallas as pl
from jax.experimental.pallas import tpu as pltpu


def _round_up(a, b):
    return (a + b - 1) // b * b


# -----------------------------------------------------------------------------
# Kernel 1: conv-as-GEMM (+bias), bf16 inputs / f32 accumulation, emitting
#           per-block partial channel sums and sums-of-squares for BatchNorm.
# -----------------------------------------------------------------------------
def conv_stats_kernel(x_ref, w_ref, b_ref, y_ref, psum_ref, pssq_ref):
    y = jnp.dot(x_ref[...], w_ref[...], preferred_element_type=jnp.float32)
    y = y + b_ref[...]                      # (tm, Cout) + (1, Cout)
    y_ref[...] = y
    # Per-block partials -> no carried accumulator -> grid axis is "parallel".
    psum_ref[...] = jnp.sum(y, axis=0, keepdims=True)[None]
    pssq_ref[...] = jnp.sum(y * y, axis=0, keepdims=True)[None]


# -----------------------------------------------------------------------------
# Kernel 2: BatchNorm affine application  y*scale + shift  (lane-dense layout).
# -----------------------------------------------------------------------------
def bn_apply_kernel(y_ref, scale_ref, shift_ref, o_ref):
    o_ref[...] = y_ref[...] * scale_ref[...] + shift_ref[...]


# -----------------------------------------------------------------------------
# Glue: im2col (pure reshaping/slicing; XLA fuses it into one pass).
# -----------------------------------------------------------------------------
def _im2col_nhwc(x_nhwc, k, stride, pad):
    x = jnp.pad(x_nhwc, ((0, 0), (pad, pad), (pad, pad), (0, 0)))
    n, hp, wp, c = x.shape
    oh = (hp - k) // stride + 1
    ow = (wp - k) // stride + 1
    patches = []
    for di in range(k):
        for dj in range(k):
            patches.append(
                x[:, di:di + stride * oh:stride, dj:dj + stride * ow:stride, :])
    cols = jnp.concatenate(patches, axis=-1)            # (N, OH, OW, k*k*C)
    return cols.reshape(n * oh * ow, k * k * c), oh, ow


# -----------------------------------------------------------------------------
# Wrapper reproducing CB.forward (conv -> BatchNorm2d in training mode).
# -----------------------------------------------------------------------------
@functools.partial(jax.jit, static_argnames=("k_size", "stride", "padding"))
def cb_forward(x_nchw, conv_w, conv_b, bn_gamma, bn_beta,
               k_size, stride, padding, eps=1e-5):
    n, cin, h, w = x_nchw.shape
    cout = conv_w.shape[0]
    k = k_size

    # ---- NCHW -> NHWC (bf16), im2col to a GEMM problem ----------------------
    x_nhwc = jnp.transpose(x_nchw, (0, 2, 3, 1)).astype(jnp.bfloat16)
    x_cols, oh, ow = _im2col_nhwc(x_nhwc, k, stride, padding)
    m, kdim = x_cols.shape

    # Pad K to a multiple of 16 (bf16 packing) and M to a multiple of the row
    # tile, so any N/H/W/stride works (replaces the old divisibility assert).
    kdim_pad = _round_up(kdim, 16)
    tm = min(1024, _round_up(m, 128))       # large, 128-aligned row tile
    m_pad = _round_up(m, tm)
    grid_m = m_pad // tm

    x_cols = jnp.pad(x_cols, ((0, m_pad - m), (0, kdim_pad - kdim)))

    # (Cout, Cin, kh, kw) -> (kh, kw, Cin, Cout) -> (kh*kw*Cin, Cout), bf16.
    w_mat = jnp.transpose(conv_w, (2, 3, 1, 0)).reshape(kdim, cout)
    w_mat = jnp.pad(w_mat, ((0, kdim_pad - kdim), (0, 0))).astype(jnp.bfloat16)
    b_mat = conv_b.reshape(1, cout).astype(jnp.float32)

    y, psum, pssq = pl.pallas_call(
        conv_stats_kernel,
        out_shape=(
            jax.ShapeDtypeStruct((m_pad, cout), jnp.float32),
            jax.ShapeDtypeStruct((grid_m, 1, cout), jnp.float32),
            jax.ShapeDtypeStruct((grid_m, 1, cout), jnp.float32),
        ),
        grid_spec=pltpu.PrefetchScalarGridSpec(
            num_scalar_prefetch=0,
            grid=(grid_m,),
            in_specs=[
                pl.BlockSpec((tm, kdim_pad), lambda i: (i, 0)),
                pl.BlockSpec((kdim_pad, cout), lambda i: (0, 0)),
                pl.BlockSpec((1, cout), lambda i: (0, 0)),
            ],
            out_specs=[
                pl.BlockSpec((tm, cout), lambda i: (i, 0)),
                pl.BlockSpec((1, 1, cout), lambda i: (i, 0, 0)),
                pl.BlockSpec((1, 1, cout), lambda i: (i, 0, 0)),
            ],
        ),
        compiler_params=pltpu.CompilerParams(
            dimension_semantics=("parallel",),
            vmem_limit_bytes=32 * 1024 * 1024),
    )(x_cols, w_mat, b_mat)

    # ---- tiny per-channel scalar math (glue) --------------------------------
    ch_sum = jnp.sum(psum, axis=0)[0]       # (cout,)
    ch_ssq = jnp.sum(pssq, axis=0)[0]       # (cout,)

    # Padded rows contribute exactly `b` (sum) and `b*b` (ssq); remove them.
    pad_rows = m_pad - m
    bias = b_mat[0]
    ch_sum = ch_sum - pad_rows * bias
    ch_ssq = ch_ssq - pad_rows * bias * bias

    mean = ch_sum / m
    var = jnp.maximum(ch_ssq / m - mean * mean, 0.0)    # biased var, clamped
    inv_std = lax.rsqrt(var + eps)
    scale = (bn_gamma * inv_std).reshape(1, cout).astype(jnp.float32)
    shift = (bn_beta - mean * bn_gamma * inv_std).reshape(1, cout).astype(jnp.float32)

    # ---- BN affine pass, lane-dense view -------------------------------------
    # Fold `fold` consecutive rows into the 128-lane dim so every store is a
    # full-width vst; fall back to (tm, cout) tiles if folding is impossible.
    if 128 % cout == 0 and tm % (8 * (128 // cout)) == 0:
        fold = 128 // cout
    else:
        fold = 1
    lane_w = fold * cout
    rows_pad = m_pad // fold
    tr = tm // fold

    y2 = y.reshape(rows_pad, lane_w)                    # bitcast-free reshape
    scale_t = jnp.tile(scale, (1, fold))                # (1, lane_w)
    shift_t = jnp.tile(shift, (1, fold))

    y_norm = pl.pallas_call(
        bn_apply_kernel,
        out_shape=jax.ShapeDtypeStruct((rows_pad, lane_w), jnp.float32),
        grid_spec=pltpu.PrefetchScalarGridSpec(
            num_scalar_prefetch=0,
            grid=(grid_m,),
            in_specs=[
                pl.BlockSpec((tr, lane_w), lambda i: (i, 0)),
                pl.BlockSpec((1, lane_w), lambda i: (0, 0)),
                pl.BlockSpec((1, lane_w), lambda i: (0, 0)),
            ],
            out_specs=pl.BlockSpec((tr, lane_w), lambda i: (i, 0)),
        ),
        input_output_aliases={0: 0},        # write in place over y
        compiler_params=pltpu.CompilerParams(
            dimension_semantics=("parallel",),
            vmem_limit_bytes=32 * 1024 * 1024),
    )(y2, scale_t, shift_t)

    # ---- back to NCHW --------------------------------------------------------
    out = y_norm.reshape(m_pad, cout)[:m].reshape(n, oh, ow, cout)
    return jnp.transpose(out, (0, 3, 1, 2))


# -----------------------------------------------------------------------------
# Pure-JAX reference (for correctness check). compute_dtype=bfloat16 mirrors the
# kernel's precision policy (bf16 operands, f32 accumulation).
# -----------------------------------------------------------------------------
def cb_reference(x_nchw, conv_w, conv_b, bn_gamma, bn_beta,
                 k_size, stride, padding, eps=1e-5, compute_dtype=jnp.float32):
    y = lax.conv_general_dilated(
        x_nchw.astype(compute_dtype), conv_w.astype(compute_dtype),
        window_strides=(stride, stride),
        padding=[(padding, padding), (padding, padding)],
        dimension_numbers=("NCHW", "OIHW", "NCHW"),
        preferred_element_type=jnp.float32,
    ) + conv_b.reshape(1, -1, 1, 1).astype(jnp.float32)
    mean = jnp.mean(y, axis=(0, 2, 3), keepdims=True)
    var = jnp.mean((y - mean) ** 2, axis=(0, 2, 3), keepdims=True)  # biased
    y_hat = (y - mean) * lax.rsqrt(var + eps)
    return y_hat * bn_gamma.reshape(1, -1, 1, 1) + bn_beta.reshape(1, -1, 1, 1)


if __name__ == "__main__":
    # CB(in_channels=4, out_channels=8, k_size=3, stride=1, padding=1)
    N, CIN, H, W = 2, 4, 16, 16
    COUT, K, STRIDE, PAD = 8, 3, 1, 1

    key = jax.random.PRNGKey(0)
    kx, kw, kb = jax.random.split(key, 3)

    x = jax.random.normal(kx, (N, CIN, H, W), dtype=jnp.float32)
    conv_w = 0.1 * jax.random.normal(kw, (COUT, CIN, K, K), dtype=jnp.float32)
    conv_b = 0.1 * jax.random.normal(kb, (COUT,), dtype=jnp.float32)
    bn_gamma = jnp.ones((COUT,), dtype=jnp.float32)   # PyTorch BN default init
    bn_beta = jnp.zeros((COUT,), dtype=jnp.float32)

    out = cb_forward(x, conv_w, conv_b, bn_gamma, bn_beta, K, STRIDE, PAD)
    out = jax.block_until_ready(out)
    assert out.shape == (N, COUT, H, W)

    # Tight check vs a reference using the same bf16 operands / f32 accumulation.
    ref_bf16 = cb_reference(x, conv_w, conv_b, bn_gamma, bn_beta, K, STRIDE, PAD,
                            compute_dtype=jnp.bfloat16)
    assert jnp.max(jnp.abs(out - ref_bf16)) < 1e-3, "mismatch vs bf16 reference"

    # Loose sanity check vs the full-f32 reference (difference = bf16 operand
    # rounding only, output is BN-normalized so ~O(1) scale).
    ref_f32 = cb_reference(x, conv_w, conv_b, bn_gamma, bn_beta, K, STRIDE, PAD,
                           compute_dtype=jnp.float32)
    assert jnp.max(jnp.abs(out - ref_f32)) < 5e-2, "mismatch vs f32 reference"

    print("KERNEL_OK")
</pallas_src>

<mosaic_0001>
module attributes {stable_mosaic.version = 11 : i64} {
  func.func @conv_stats_kernel(%arg0: i32, %arg1: memref<512x48xbf16, #tpu.memory_space<vmem>>, %arg2: memref<48x8xbf16, #tpu.memory_space<vmem>>, %arg3: memref<1x8xf32, #tpu.memory_space<vmem>>, %arg4: memref<512x8xf32, #tpu.memory_space<vmem>>, %arg5: memref<1x1x8xf32, #tpu.memory_space<vmem>>, %arg6: memref<1x1x8xf32, #tpu.memory_space<vmem>>) attributes {dimension_semantics = [#tpu.dimension_semantics<parallel>], iteration_bounds = array<i64: 1>, scalar_prefetch = 0 : i64, scratch_operands = 0 : i64, tpu.core_type = #tpu.core_type<tc>, window_params = [{transform_indices = @transform_0, window_bounds = array<i64: 512, 48>}, {pipeline_mode = #tpu.pipeline_mode<synchronous>, transform_indices = @transform_1, window_bounds = array<i64: 48, 8>}, {pipeline_mode = #tpu.pipeline_mode<synchronous>, transform_indices = @transform_2, window_bounds = array<i64: 1, 8>}, {transform_indices = @transform_3, window_bounds = array<i64: 512, 8>}, {transform_indices = @transform_4, window_bounds = array<i64: 1, 1, 8>}, {transform_indices = @transform_5, window_bounds = array<i64: 1, 1, 8>}]} {
    %c0 = arith.constant 0 : index
    %c0_0 = arith.constant 0 : index
    %0 = vector.load %arg1[%c0, %c0_0] : memref<512x48xbf16, #tpu.memory_space<vmem>>, vector<512x48xbf16>
    %c0_1 = arith.constant 0 : index
    %c0_2 = arith.constant 0 : index
    %1 = vector.load %arg2[%c0_1, %c0_2] : memref<48x8xbf16, #tpu.memory_space<vmem>>, vector<48x8xbf16>
    %cst = arith.constant dense<0.000000e+00> : vector<512x8xf32>
    %2 = tpu.matmul %0, %1, %cst {dimension_numbers = #tpu.dot_dimension_numbers<[1], [0], [0], [1], [0, 0, 1, 1], [], []>} : vector<512x48xbf16>, vector<48x8xbf16>, vector<512x8xf32> -> vector<512x8xf32>
    %c0_3 = arith.constant 0 : index
    %c0_4 = arith.constant 0 : index
    %3 = vector.load %arg3[%c0_3, %c0_4] : memref<1x8xf32, #tpu.memory_space<vmem>>, vector<1x8xf32>
    %4 = vector.broadcast %3 : vector<1x8xf32> to vector<512x8xf32>
    %5 = arith.addf %2, %4 : vector<512x8xf32>
    %c0_5 = arith.constant 0 : index
    %c0_6 = arith.constant 0 : index
    %6 = vector.load %arg4[%c0_5, %c0_6] : memref<512x8xf32, #tpu.memory_space<vmem>>, vector<512x8xf32>
    tpu.vector_store %arg4[%c0_5, %c0_6], %5 {strides = array<i32>} : memref<512x8xf32, #tpu.memory_space<vmem>>, vector<512x8xf32>,
    %cst_7 = arith.constant dense<0.000000e+00> : vector<8xf32>
    %7 = vector.multi_reduction <add>, %5, %cst_7 [0] : vector<512x8xf32> to vector<8xf32>
    %8 = vector.shape_cast %7 : vector<8xf32> to vector<1x8xf32>
    %9 = vector.shape_cast %8 : vector<1x8xf32> to vector<1x1x8xf32>
    %c0_8 = arith.constant 0 : index
    %c0_9 = arith.constant 0 : index
    %c0_10 = arith.constant 0 : index
    %10 = vector.load %arg5[%c0_8, %c0_9, %c0_10] : memref<1x1x8xf32, #tpu.memory_space<vmem>>, vector<1x1x8xf32>
    tpu.vector_store %arg5[%c0_8, %c0_9, %c0_10], %9 {strides = array<i32>} : memref<1x1x8xf32, #tpu.memory_space<vmem>>, vector<1x1x8xf32>,
    %11 = arith.mulf %5, %5 : vector<512x8xf32>
    %cst_11 = arith.constant dense<0.000000e+00> : vector<8xf32>
    %12 = vector.multi_reduction <add>, %11, %cst_11 [0] : vector<512x8xf32> to vector<8xf32>
    %13 = vector.shape_cast %12 : vector<8xf32> to vector<1x8xf32>
    %14 = vector.shape_cast %13 : vector<1x8xf32> to vector<1x1x8xf32>
    %c0_12 = arith.constant 0 : index
    %c0_13 = arith.constant 0 : index
    %c0_14 = arith.constant 0 : index
    %15 = vector.load %arg6[%c0_12, %c0_13, %c0_14] : memref<1x1x8xf32, #tpu.memory_space<vmem>>, vector<1x1x8xf32>
    tpu.vector_store %arg6[%c0_12, %c0_13, %c0_14], %14 {strides = array<i32>} : memref<1x1x8xf32, #tpu.memory_space<vmem>>, vector<1x1x8xf32>,
    return
  }
  func.func @transform_0(%arg0: i32) -> (i32, i32) {
    %c0_i32 = arith.constant 0 : i32
    %c0_i32_0 = arith.constant 0 : i32
    return %arg0, %c0_i32 : i32, i32
  }
  func.func @transform_1(%arg0: i32) -> (i32, i32) {
    %c0_i32 = arith.constant 0 : i32
    %c0_i32_0 = arith.constant 0 : i32
    %c0_i32_1 = arith.constant 0 : i32
    return %c0_i32, %c0_i32_0 : i32, i32
  }
  func.func @transform_2(%arg0: i32) -> (i32, i32) {
    %c0_i32 = arith.constant 0 : i32
    %c0_i32_0 = arith.constant 0 : i32
    %c0_i32_1 = arith.constant 0 : i32
    return %c0_i32, %c0_i32_0 : i32, i32
  }
  func.func @transform_3(%arg0: i32) -> (i32, i32) {
    %c0_i32 = arith.constant 0 : i32
    %c0_i32_0 = arith.constant 0 : i32
    return %arg0, %c0_i32 : i32, i32
  }
  func.func @transform_4(%arg0: i32) -> (i32, i32, i32) {
    %c0_i32 = arith.constant 0 : i32
    %c0_i32_0 = arith.constant 0 : i32
    %c0_i32_1 = arith.constant 0 : i32
    return %arg0, %c0_i32, %c0_i32_0 : i32, i32, i32
  }
  func.func @transform_5(%arg0: i32) -> (i32, i32, i32) {
    %c0_i32 = arith.constant 0 : i32
    %c0_i32_0 = arith.constant 0 : i32
    %c0_i32_1 = arith.constant 0 : i32
    return %arg0, %c0_i32, %c0_i32_0 : i32, i32, i32
  }
}

module attributes {stable_mosaic.version = 11 : i64} {
  func.func @bn_apply_kernel(%arg0: i32, %arg1: memref<32x128xf32, #tpu.memory_space<vmem>>, %arg2: memref<1x128xf32, #tpu.memory_space<vmem>>, %arg3: memref<1x128xf32, #tpu.memory_space<vmem>>, %arg4: memref<32x128xf32, #tpu.memory_space<vmem>>) attributes {dimension_semantics = [#tpu.dimension_semantics<parallel>], iteration_bounds = array<i64: 1>, scalar_prefetch = 0 : i64, scratch_operands = 0 : i64, tpu.core_type = #tpu.core_type<tc>, window_params = [{transform_indices = @transform_0, window_bounds = array<i64: 32, 128>}, {pipeline_mode = #tpu.pipeline_mode<synchronous>, transform_indices = @transform_1, window_bounds = array<i64: 1, 128>}, {pipeline_mode = #tpu.pipeline_mode<synchronous>, transform_indices = @transform_2, window_bounds = array<i64: 1, 128>}, {transform_indices = @transform_3, window_bounds = array<i64: 32, 128>}]} {
    %c0 = arith.constant 0 : index
    %c0_0 = arith.constant 0 : index
    %0 = vector.load %arg1[%c0, %c0_0] : memref<32x128xf32, #tpu.memory_space<vmem>>, vector<32x128xf32>
    %c0_1 = arith.constant 0 : index
    %c0_2 = arith.constant 0 : index
    %1 = vector.load %arg2[%c0_1, %c0_2] : memref<1x128xf32, #tpu.memory_space<vmem>>, vector<1x128xf32>
    %2 = vector.broadcast %1 : vector<1x128xf32> to vector<32x128xf32>
    %3 = arith.mulf %0, %2 : vector<32x128xf32>
    %c0_3 = arith.constant 0 : index
    %c0_4 = arith.constant 0 : index
    %4 = vector.load %arg3[%c0_3, %c0_4] : memref<1x128xf32, #tpu.memory_space<vmem>>, vector<1x128xf32>
    %5 = vector.broadcast %4 : vector<1x128xf32> to vector<32x128xf32>
    %6 = arith.addf %3, %5 : vector<32x128xf32>
    %c0_5 = arith.constant 0 : index
    %c0_6 = arith.constant 0 : index
    %7 = vector.load %arg4[%c0_5, %c0_6] : memref<32x128xf32, #tpu.memory_space<vmem>>, vector<32x128xf32>
    tpu.vector_store %arg4[%c0_5, %c0_6], %6 {strides = array<i32>} : memref<32x128xf32, #tpu.memory_space<vmem>>, vector<32x128xf32>,
    return
  }
  func.func @transform_0(%arg0: i32) -> (i32, i32) {
    %c0_i32 = arith.constant 0 : i32
    %c0_i32_0 = arith.constant 0 : i32
    return %arg0, %c0_i32 : i32, i32
  }
  func.func @transform_1(%arg0: i32) -> (i32, i32) {
    %c0_i32 = arith.constant 0 : i32
    %c0_i32_0 = arith.constant 0 : i32
    %c0_i32_1 = arith.constant 0 : i32
    return %c0_i32, %c0_i32_0 : i32, i32
  }
  func.func @transform_2(%arg0: i32) -> (i32, i32) {
    %c0_i32 = arith.constant 0 : i32
    %c0_i32_0 = arith.constant 0 : i32
    %c0_i32_1 = arith.constant 0 : i32
    return %c0_i32, %c0_i32_0 : i32, i32
  }
  func.func @transform_3(%arg0: i32) -> (i32, i32) {
    %c0_i32 = arith.constant 0 : i32
    %c0_i32_0 = arith.constant 0 : i32
    return %arg0, %c0_i32 : i32, i32
  }
}

</mosaic_0001>

<bundles_post_ra>
// kernel: cb_forward.3
= control target key start
LH: loop header
LB: loop body
LE: loop exit
PB: predicated region body
PF: predicated region fallthrough
CT: control target
= control target key end

     0   :  { %s100_s0 = inlined_call_operand.vmem [shape: f32[32,128], index: 0, kind: input, shape index: {}, may-alias: {0,3}]   ;;  %s101_s1 = inlined_call_operand.vmem [shape: f32[1,128], index: 1, kind: input, shape index: {}]   ;;  %s102_s2 = inlined_call_operand.vmem [shape: f32[1,128], index: 2, kind: input, shape index: {}]   ;;  %s103_s3 = inlined_call_operand.vmem [shape: f32[32,128], index: 3, kind: output, shape index: {}, may-alias: {0,3}]  }
   0x1   :  { %v14_v0 = vld [vmem:[%s100_s0] sm:$0xff]  ;;  %v15_v4 = vld [vmem:[%s100_s0 + $0x8] sm:$0xff]  ;;  %v16_v5 = vld [vmem:[%s100_s0 + $0x10] sm:$0xff] }
   0x2   :  { %v48_v1 = vld [vmem:[%s101_s1] ss:$0 sm:$0xff]  ;;  %v17_v6 = vld [vmem:[%s100_s0 + $0x18] sm:$0xff] }
   0x3   :  { %v49_v2 = vld [vmem:[%s102_s2] ss:$0 sm:$0xff]  ;;  %v25_v3 = vmul.f32 %v48_v1, %v14_v0  ;;  %v26_v7 = vmul.f32 %v48_v1, %v15_v4  ;;  %v27_v8 = vmul.f32 %v48_v1, %v16_v5  ;;  %v28_v9 = vmul.f32 %v48_v1, %v17_v6 }
   0x5   :  { %v36_v10 = vadd.f32 %v49_v2, %v25_v3  ;;  %v37_v11 = vadd.f32 %v49_v2, %v26_v7  ;;  %v38_v12 = vadd.f32 %v49_v2, %v27_v8  ;;  %v39_v13 = vadd.f32 %v49_v2, %v28_v9 }
   0x7   :  { %40 = vst [vmem:[%s103_s3] sm:$0xff] %v36_v10  ;;  %41 = vst [vmem:[%s103_s3 + $0x8] sm:$0xff] %v37_v11 }
   0x8   :  { %42 = vst [vmem:[%s103_s3 + $0x10] sm:$0xff] %v38_v12  ;;  %43 = vst [vmem:[%s103_s3 + $0x18] sm:$0xff] %v39_v13 }

// kernel: cb_forward.2
= control target key start
LH: loop header
LB: loop body
LE: loop exit
PB: predicated region body
PF: predicated region fallthrough
CT: control target
= control target key end

     0   :  { %vm273_vm0 = vcmask 392192   ;;  %vm659_vm1 = vcmask 64512   ;;  %vm857_vm2 = vcmask 57344   ;;  %s2164_s1 = inlined_call_operand.vmem [shape: bf16[48,8], index: 1, kind: input, shape index: {}]   ;;  %s2165_s0 = inlined_call_operand.vmem [shape: bf16[512,48], index: 0, kind: input, shape index: {}]   ;;  %s2166_s2 = inlined_call_operand.vmem [shape: f32[1,8], index: 2, kind: input, shape index: {}]   ;;  %s2167_s3 = inlined_call_operand.vmem [shape: f32[512,8], index: 3, kind: output, shape index: {0}]   ;;  %s2168_s4 = inlined_call_operand.vmem [shape: f32[1,1,8], index: 4, kind: output, shape index: {1}]   ;;  %s2169_s5 = inlined_call_operand.vmem [shape: f32[1,1,8], index: 5, kind: output, shape index: {2}]  }
   0x1   :  { %v1248_v0 = vld [vmem:[%s2164_s1 + $0x10] sm:$0xff]   ;;  %v1249_v1 = vld [vmem:[%s2164_s1 + $0x8] sm:$0xff]   ;;  %v1251_v2 = vld [vmem:[%s2165_s0] sm:$0xff]  }
   0x2   :  { %1172 = vmatprep.subr.bf16.mxu0 %v1248_v0  ;;  %1242 = vmatprep.subr.bf16.mxu1 %v1248_v0  ;;  %v1250_v3 = vld [vmem:[%s2164_s1] sm:$0xff]   ;;  %v1252_v4 = vld [vmem:[%s2165_s0 + $0x8] sm:$0xff]   ;;  %v1253_v5 = vld [vmem:[%s2165_s0 + $0x10] sm:$0xff]  }
   0x3   :  { %1173 = vmatpush3.bf16.msra.mxu0 %v1248_v0  ;;  %1245 = vmatpush3.bf16.msra.mxu1 %v1248_v0  ;;  %v1254_v6 = vld [vmem:[%s2165_s0 + $0x18] sm:$0xff]   ;;  %v1255_v7 = vld [vmem:[%s2165_s0 + $0x20] sm:$0xff]   ;;  %v1268_v9 = vld [vmem:[%s2165_s0 + $0x88] sm:$0xff]  }
   0x4   :  { %1174 = vmatprep.subr.bf16.mxu0 %v1249_v1  ;;  %1243 = vmatprep.subr.bf16.mxu1 %v1249_v1  ;;  %v1267_v8 = vld [vmem:[%s2165_s0 + $0x80] sm:$0xff]   ;;  %v1269_v10 = vld [vmem:[%s2165_s0 + $0x90] sm:$0xff]   ;;  %v1256_v11 = vld [vmem:[%s2165_s0 + $0x28] sm:$0xff]  }
   0x5   :  { %1178 = vmatprep.mubr.msk.bf16.mxu0 %vm273_vm0, %v1251_v2  ;;  %1210 = vmatprep.mubr.msk.bf16.mxu1 %vm273_vm0, %v1267_v8  ;;  %v1257_v12 = vld [vmem:[%s2165_s0 + $0x30] sm:$0xff]   ;;  %v1270_v13 = vld [vmem:[%s2165_s0 + $0x98] sm:$0xff]   ;;  %v1271_v14 = vld [vmem:[%s2165_s0 + $0xa0] sm:$0xff]  }
   0x6   :  { %v1258_v15 = vld [vmem:[%s2165_s0 + $0x38] sm:$0xff]   ;;  %v1272_v16 = vld [vmem:[%s2165_s0 + $0xa8] sm:$0xff]   ;;  %v1259_v17 = vld [vmem:[%s2165_s0 + $0x40] sm:$0xff]  }
   0x7   :  { %1175 = vmatpush3.bf16.msra.mxu0 %v1249_v1  ;;  %1246 = vmatpush3.bf16.msra.mxu1 %v1249_v1  ;;  %v1273_v18 = vld [vmem:[%s2165_s0 + $0xb0] sm:$0xff]   ;;  %v1260_v19 = vld [vmem:[%s2165_s0 + $0x48] sm:$0xff]   ;;  %v1274_v20 = vld [vmem:[%s2165_s0 + $0xb8] sm:$0xff]  }
   0x8   :  { %1176 = vmatprep.subr.bf16.mxu0 %v1250_v3  ;;  %1244 = vmatprep.subr.bf16.mxu1 %v1250_v3  ;;  %v1261_v21 = vld [vmem:[%s2165_s0 + $0x50] sm:$0xff]   ;;  %v1275_v22 = vld [vmem:[%s2165_s0 + $0xc0] sm:$0xff]   ;;  %v1262_v23 = vld [vmem:[%s2165_s0 + $0x58] sm:$0xff]  }
   0x9   :  { %v1276_v24 = vld [vmem:[%s2165_s0 + $0xc8] sm:$0xff]   ;;  %v1263_v25 = vld [vmem:[%s2165_s0 + $0x60] sm:$0xff]   ;;  %v1277_v26 = vld [vmem:[%s2165_s0 + $0xd0] sm:$0xff]  }
   0xa   :  { %v1264_v27 = vld [vmem:[%s2165_s0 + $0x68] sm:$0xff]   ;;  %v1278_v28 = vld [vmem:[%s2165_s0 + $0xd8] sm:$0xff]   ;;  %v1265_v29 = vld [vmem:[%s2165_s0 + $0x70] sm:$0xff]  }
   0xb   :  { %1177 = vmatpush3.bf16.msra.mxu0 %v1250_v3  ;;  %1247 = vmatpush3.bf16.msra.mxu1 %v1250_v3  ;;  %v1279_v30 = vld [vmem:[%s2165_s0 + $0xe0] sm:$0xff]   ;;  %v1266_v31 = vld [vmem:[%s2165_s0 + $0x78] sm:$0xff]   ;;  %v1280_v32 = vld [vmem:[%s2165_s0 + $0xe8] sm:$0xff]  }
   0xc   :  { %v1281_v33 = vld [vmem:[%s2165_s0 + $0xf0] sm:$0xff]   ;;  %v1282_v34 = vld [vmem:[%s2165_s0 + $0xf8] sm:$0xff]   ;;  %v1453_v35 = vld [vmem:[%s2166_s2] ss:$0 sm:$0xff] }
   0xe   :  { %1179 = vmatmul.mubr.msk.bf16.vlgmr.msra.gmra.mxu0 %vm273_vm0, %v1252_v4  ;;  %1211 = vmatmul.mubr.msk.bf16.vlgmr.msra.gmra.mxu1 %vm273_vm0, %v1268_v9 }
   0xf   :  { %1182 = vmatprep.mubr.msk.bf16.mxu0 %vm273_vm0, %v1253_v5  ;;  %1214 = vmatprep.mubr.msk.bf16.mxu1 %vm273_vm0, %v1269_v10 }
  0x16   :  { %1183 = vmatmul.mubr.msk.bf16.gmra.mxu0 %vm273_vm0, %v1254_v6  ;;  %1215 = vmatmul.mubr.msk.bf16.gmra.mxu1 %vm273_vm0, %v1270_v13 }
  0x17   :  { %1186 = vmatprep.mubr.msk.bf16.mxu0 %vm273_vm0, %v1255_v7  ;;  %1218 = vmatprep.mubr.msk.bf16.mxu1 %vm273_vm0, %v1271_v14 }
  0x1e   :  { %1187 = vmatmul.mubr.msk.bf16.gmra.mxu0 %vm273_vm0, %v1256_v11  ;;  %1219 = vmatmul.mubr.msk.bf16.gmra.mxu1 %vm273_vm0, %v1272_v16 }
  0x1f   :  { %1190 = vmatprep.mubr.msk.bf16.mxu0 %vm273_vm0, %v1257_v12  ;;  %1222 = vmatprep.mubr.msk.bf16.mxu1 %vm273_vm0, %v1273_v18 }
  0x26   :  { %1191 = vmatmul.mubr.msk.bf16.gmra.mxu0 %vm273_vm0, %v1258_v15  ;;  %1223 = vmatmul.mubr.msk.bf16.gmra.mxu1 %vm273_vm0, %v1274_v20 }
  0x27   :  { %1194 = vmatprep.mubr.msk.bf16.mxu0 %vm273_vm0, %v1259_v17  ;;  %1226 = vmatprep.mubr.msk.bf16.mxu1 %vm273_vm0, %v1275_v22 }
  0x2e   :  { %1195 = vmatmul.mubr.msk.bf16.gmra.mxu0 %vm273_vm0, %v1260_v19  ;;  %1227 = vmatmul.mubr.msk.bf16.gmra.mxu1 %vm273_vm0, %v1276_v24 }
  0x2f   :  { %1198 = vmatprep.mubr.msk.bf16.mxu0 %vm273_vm0, %v1261_v21  ;;  %1230 = vmatprep.mubr.msk.bf16.mxu1 %vm273_vm0, %v1277_v26 }
  0x36   :  { %1199 = vmatmul.mubr.msk.bf16.gmra.mxu0 %vm273_vm0, %v1262_v23  ;;  %1231 = vmatmul.mubr.msk.bf16.gmra.mxu1 %vm273_vm0, %v1278_v28 }
  0x37   :  { %1202 = vmatprep.mubr.msk.bf16.mxu0 %vm273_vm0, %v1263_v25  ;;  %1234 = vmatprep.mubr.msk.bf16.mxu1 %vm273_vm0, %v1279_v30 }
  0x3e   :  { %1203 = vmatmul.mubr.msk.bf16.gmra.mxu0 %vm273_vm0, %v1264_v27  ;;  %1235 = vmatmul.mubr.msk.bf16.gmra.mxu1 %vm273_vm0, %v1280_v32 }
  0x3f   :  { %1206 = vmatprep.mubr.msk.bf16.mxu0 %vm273_vm0, %v1265_v29  ;;  %1238 = vmatprep.mubr.msk.bf16.mxu1 %vm273_vm0, %v1281_v33 }
  0x46   :  { %1207 = vmatmul.mubr.msk.bf16.gmra.mxu0 %vm273_vm0, %v1266_v31  ;;  %1239 = vmatmul.mubr.msk.bf16.gmra.mxu1 %vm273_vm0, %v1282_v34 }
  0xce   :  { %v1180_v36 = vpop.f32.mrf.mxu0  ;;  %v1212_v47 = vpop.f32.mrf.mxu1 }
  0xcf   :  { %v413_v37 = vadd.f32 %v1180_v36, %v1453_v35  ;;  %v1480_v55 = vadd.f32 %v1212_v47, %v1453_v35 }
  0xd0   :  { %v404_v38 = vpop.f32.mrf.mxu0  ;;  %v532_v56 = vpop.f32.mrf.mxu1 }
  0xd1   :  { %662 = vst.msk [vmem:[%s2167_s3 + $0x10] sm:$0xff] %vm659_vm1, %v413_v37  ;;  %v405_v39 = vadd.f32 %v1453_v35, %v404_v38  ;;  %v861_v45 = vmul.f32 %v413_v37, %v413_v37  ;;  %v727_v52 = vsel %vm659_vm1, %v413_v37, 0.0  ;;  %694 = vst.msk [vmem:[%s2167_s3 + $0x110] sm:$0xff] %vm659_vm1, %v1480_v55  ;;  %v1502_v8 = vadd.f32 %v1453_v35, %v532_v56 }
  0xd2   :  { %v1181_v40 = vpop.f32.mrf.mxu0  ;;  %v1213_v0 = vpop.f32.mrf.mxu1 }
  0xd3   :  { %660 = vst.msk [vmem:[%s2167_s3] sm:$0xff] %vm659_vm1, %v405_v39  ;;  %v416_v41 = vadd.f32 %v1181_v40, %v1453_v35  ;;  %v859_v43 = vmul.f32 %v405_v39, %v405_v39  ;;  %v724_v48 = vsel %vm659_vm1, %v405_v39, 0.0  ;;  %v926_v1 = vsel %vm659_vm1, %v861_v45, 0.0  ;;  %692 = vst.msk [vmem:[%s2167_s3 + $0x100] sm:$0xff] %vm659_vm1, %v1502_v8 }
  0xd4   :  { %v407_v42 = vpop.f32.mrf.mxu0  ;;  %v535_v9 = vpop.f32.mrf.mxu1  ;;  %v1524_v25 = vadd.f32 %v1213_v0, %v1453_v35 }
  0xd5   :  { %663 = vst.msk [vmem:[%s2167_s3 + $0x18] sm:$0xff] %vm659_vm1, %v416_v41  ;;  %v408_v44 = vadd.f32 %v1453_v35, %v407_v42  ;;  %v923_v57 = vsel %vm659_vm1, %v859_v43, 0.0  ;;  %v862_v58 = vmul.f32 %v416_v41, %v416_v41  ;;  %v729_v2 = vsel %vm659_vm1, %v416_v41, 0.0 }
  0xd6   :  { %v1184_v46 = vpop.f32.mrf.mxu0  ;;  %v1216_v17 = vpop.f32.mrf.mxu1  ;;  %695 = vst.msk [vmem:[%s2167_s3 + $0x118] sm:$0xff] %vm659_vm1, %v1524_v25  ;;  %v1548_v43 = vadd.f32 %v1453_v35, %v535_v9 }
  0xd7   :  { %661 = vst.msk [vmem:[%s2167_s3 + $0x8] sm:$0xff] %vm659_vm1, %v408_v44  ;;  %v725_v49 = vsel %vm659_vm1, %v408_v44, 0.0  ;;  %v860_v50 = vmul.f32 %v408_v44, %v408_v44  ;;  %v429_v51 = vadd.f32 %v1184_v46, %v1453_v35  ;;  %v928_v10 = vsel %vm659_vm1, %v862_v58, 0.0 }
  0xd8   :  { %v726_v53 = vadd.f32 %v725_v49, %v724_v48  ;;  %v420_v54 = vpop.f32.mrf.mxu0  ;;  %v548_v26 = vpop.f32.mrf.mxu1  ;;  %693 = vst.msk [vmem:[%s2167_s3 + $0x108] sm:$0xff] %vm659_vm1, %v1548_v43 }
  0xd9   :  { %v924_v59 = vsel %vm659_vm1, %v860_v50, 0.0  ;;  %666 = vst.msk [vmem:[%s2167_s3 + $0x30] sm:$0xff] %vm659_vm1, %v429_v51  ;;  %v421_v60 = vadd.f32 %v1453_v35, %v420_v54  ;;  %v865_v13 = vmul.f32 %v429_v51, %v429_v51  ;;  %v735_v27 = vsel %vm659_vm1, %v429_v51, 0.0 }
  0xda   :  { %v728_v61 = vadd.f32 %v727_v52, %v726_v53  ;;  %v925_v62 = vadd.f32 %v924_v59, %v923_v57  ;;  %v1185_v63 = vpop.f32.mrf.mxu0  ;;  %v1538_v34 = vpop.f32.mrf.mxu1 }
  0xdb   :  { %664 = vst.msk [vmem:[%s2167_s3 + $0x20] sm:$0xff] %vm659_vm1, %v421_v60  ;;  %v863_v3 = vmul.f32 %v421_v60, %v421_v60  ;;  %v432_v4 = vadd.f32 %v1185_v63, %v1453_v35  ;;  %v731_v11 = vsel %vm659_vm1, %v421_v60, 0.0  ;;  %v934_v36 = vsel %vm659_vm1, %v865_v13, 0.0 }
  0xdc   :  { %v927_v5 = vadd.f32 %v926_v1, %v925_v62  ;;  %v730_v6 = vadd.f32 %v729_v2, %v728_v61  ;;  %v423_v7 = vpop.f32.mrf.mxu0  ;;  %v1550_v44 = vpop.f32.mrf.mxu1  ;;  %v1574_v61 = vadd.f32 %v1216_v17, %v1453_v35 }
  0xdd   :  { %667 = vst.msk [vmem:[%s2167_s3 + $0x38] sm:$0xff] %vm659_vm1, %v432_v4  ;;  %v424_v12 = vadd.f32 %v1453_v35, %v423_v7  ;;  %v930_v18 = vsel %vm659_vm1, %v863_v3, 0.0  ;;  %v866_v28 = vmul.f32 %v432_v4, %v432_v4  ;;  %v737_v37 = vsel %vm659_vm1, %v432_v4, 0.0 }
  0xde   :  { %v732_v14 = vadd.f32 %v731_v11, %v730_v6  ;;  %v929_v15 = vadd.f32 %v928_v10, %v927_v5  ;;  %v1188_v16 = vpop.f32.mrf.mxu0  ;;  %v1564_v52 = vpop.f32.mrf.mxu1  ;;  %698 = vst.msk [vmem:[%s2167_s3 + $0x130] sm:$0xff] %vm659_vm1, %v1574_v61 }
  0xdf   :  { %665 = vst.msk [vmem:[%s2167_s3 + $0x28] sm:$0xff] %vm659_vm1, %v424_v12  ;;  %v733_v19 = vsel %vm659_vm1, %v424_v12, 0.0  ;;  %v864_v20 = vmul.f32 %v424_v12, %v424_v12  ;;  %v445_v21 = vadd.f32 %v1188_v16, %v1453_v35  ;;  %v936_v45 = vsel %vm659_vm1, %v866_v28, 0.0 }
  0xe0   :  { %v931_v22 = vadd.f32 %v930_v18, %v929_v15  ;;  %v734_v23 = vadd.f32 %v733_v19, %v732_v14  ;;  %v436_v24 = vpop.f32.mrf.mxu0  ;;  %v1576_v62 = vpop.f32.mrf.mxu1  ;;  %v1600_v15 = vadd.f32 %v1453_v35, %v548_v26 }
  0xe1   :  { %v932_v29 = vsel %vm659_vm1, %v864_v20, 0.0  ;;  %670 = vst.msk [vmem:[%s2167_s3 + $0x50] sm:$0xff] %vm659_vm1, %v445_v21  ;;  %v437_v30 = vadd.f32 %v1453_v35, %v436_v24  ;;  %v869_v48 = vmul.f32 %v445_v21, %v445_v21  ;;  %v743_v63 = vsel %vm659_vm1, %v445_v21, 0.0 }
  0xe2   :  { %v736_v31 = vadd.f32 %v735_v27, %v734_v23  ;;  %v933_v32 = vadd.f32 %v932_v29, %v931_v22  ;;  %v1189_v33 = vpop.f32.mrf.mxu0  ;;  %v1590_v6 = vpop.f32.mrf.mxu1  ;;  %696 = vst.msk [vmem:[%s2167_s3 + $0x120] sm:$0xff] %vm659_vm1, %v1600_v15 }
  0xe3   :  { %668 = vst.msk [vmem:[%s2167_s3 + $0x40] sm:$0xff] %vm659_vm1, %v437_v30  ;;  %v867_v38 = vmul.f32 %v437_v30, %v437_v30  ;;  %v448_v39 = vadd.f32 %v1189_v33, %v1453_v35  ;;  %v739_v46 = vsel %vm659_vm1, %v437_v30, 0.0  ;;  %v942_v7 = vsel %vm659_vm1, %v869_v48, 0.0 }
  0xe4   :  { %v935_v40 = vadd.f32 %v934_v36, %v933_v32  ;;  %v738_v41 = vadd.f32 %v737_v37, %v736_v31  ;;  %v439_v42 = vpop.f32.mrf.mxu0  ;;  %v1602_v16 = vpop.f32.mrf.mxu1  ;;  %v1627_v33 = vadd.f32 %v1538_v34, %v1453_v35 }
  0xe5   :  { %671 = vst.msk [vmem:[%s2167_s3 + $0x58] sm:$0xff] %vm659_vm1, %v448_v39  ;;  %v440_v47 = vadd.f32 %v1453_v35, %v439_v42  ;;  %v938_v53 = vsel %vm659_vm1, %v867_v38, 0.0  ;;  %v870_v0 = vmul.f32 %v448_v39, %v448_v39  ;;  %v745_v9 = vsel %vm659_vm1, %v448_v39, 0.0 }
  0xe6   :  { %v740_v49 = vadd.f32 %v739_v46, %v738_v41  ;;  %v937_v50 = vadd.f32 %v936_v45, %v935_v40  ;;  %v1192_v51 = vpop.f32.mrf.mxu0  ;;  %v1616_v24 = vpop.f32.mrf.mxu1  ;;  %699 = vst.msk [vmem:[%s2167_s3 + $0x138] sm:$0xff] %vm659_vm1, %v1627_v33 }
  0xe7   :  { %669 = vst.msk [vmem:[%s2167_s3 + $0x48] sm:$0xff] %vm659_vm1, %v440_v47  ;;  %v741_v54 = vsel %vm659_vm1, %v440_v47, 0.0  ;;  %v868_v56 = vmul.f32 %v440_v47, %v440_v47  ;;  %v461_v57 = vadd.f32 %v1192_v51, %v1453_v35  ;;  %v944_v17 = vsel %vm659_vm1, %v870_v0, 0.0 }
  0xe8   :  { %v939_v58 = vadd.f32 %v938_v53, %v937_v50  ;;  %v742_v59 = vadd.f32 %v741_v54, %v740_v49  ;;  %v452_v60 = vpop.f32.mrf.mxu0  ;;  %v1629_v36 = vpop.f32.mrf.mxu1  ;;  %v1654_v54 = vadd.f32 %v1453_v35, %v1550_v44 }
  0xe9   :  { %v940_v1 = vsel %vm659_vm1, %v868_v56, 0.0  ;;  %674 = vst.msk [vmem:[%s2167_s3 + $0x70] sm:$0xff] %vm659_vm1, %v461_v57  ;;  %v453_v2 = vadd.f32 %v1453_v35, %v452_v60  ;;  %v873_v20 = vmul.f32 %v461_v57, %v461_v57  ;;  %v751_v37 = vsel %vm659_vm1, %v461_v57, 0.0 }
  0xea   :  { %v744_v3 = vadd.f32 %v743_v63, %v742_v59  ;;  %v941_v4 = vadd.f32 %v940_v1, %v939_v58  ;;  %v1193_v5 = vpop.f32.mrf.mxu0  ;;  %v1643_v34 = vpop.f32.mrf.mxu1  ;;  %697 = vst.msk [vmem:[%s2167_s3 + $0x128] sm:$0xff] %vm659_vm1, %v1654_v54 }
  0xeb   :  { %672 = vst.msk [vmem:[%s2167_s3 + $0x60] sm:$0xff] %vm659_vm1, %v453_v2  ;;  %v871_v10 = vmul.f32 %v453_v2, %v453_v2  ;;  %v464_v11 = vadd.f32 %v1193_v5, %v1453_v35  ;;  %v747_v18 = vsel %vm659_vm1, %v453_v2, 0.0  ;;  %v950_v46 = vsel %vm659_vm1, %v873_v20, 0.0 }
  0xec   :  { %v943_v12 = vadd.f32 %v942_v7, %v941_v4  ;;  %v746_v13 = vadd.f32 %v745_v9, %v744_v3  ;;  %v455_v14 = vpop.f32.mrf.mxu0  ;;  %v1656_v56 = vpop.f32.mrf.mxu1 }
  0xed   :  { %675 = vst.msk [vmem:[%s2167_s3 + $0x78] sm:$0xff] %vm659_vm1, %v464_v11  ;;  %v456_v19 = vadd.f32 %v1453_v35, %v455_v14  ;;  %v946_v26 = vsel %vm659_vm1, %v871_v10, 0.0  ;;  %v874_v38 = vmul.f32 %v464_v11, %v464_v11  ;;  %v753_v47 = vsel %vm659_vm1, %v464_v11, 0.0 }
  0xee   :  { %v748_v21 = vadd.f32 %v747_v18, %v746_v13  ;;  %v945_v22 = vadd.f32 %v944_v17, %v943_v12  ;;  %v1196_v23 = vpop.f32.mrf.mxu0  ;;  %v1670_v44 = vpop.f32.mrf.mxu1  ;;  %v1681_v11 = vadd.f32 %v1564_v52, %v1453_v35 }
  0xef   :  { %673 = vst.msk [vmem:[%s2167_s3 + $0x68] sm:$0xff] %vm659_vm1, %v456_v19  ;;  %v749_v27 = vsel %vm659_vm1, %v456_v19, 0.0  ;;  %v872_v28 = vmul.f32 %v456_v19, %v456_v19  ;;  %v477_v29 = vadd.f32 %v1196_v23, %v1453_v35  ;;  %v952_v57 = vsel %vm659_vm1, %v874_v38, 0.0 }
  0xf0   :  { %v947_v30 = vadd.f32 %v946_v26, %v945_v22  ;;  %v750_v31 = vadd.f32 %v749_v27, %v748_v21  ;;  %v468_v32 = vpop.f32.mrf.mxu0  ;;  %v1683_v12 = vpop.f32.mrf.mxu1  ;;  %702 = vst.msk [vmem:[%s2167_s3 + $0x150] sm:$0xff] %vm659_vm1, %v1681_v11 }
  0xf1   :  { %v948_v39 = vsel %vm659_vm1, %v872_v28, 0.0  ;;  %678 = vst.msk [vmem:[%s2167_s3 + $0x90] sm:$0xff] %vm659_vm1, %v477_v29  ;;  %v469_v40 = vadd.f32 %v1453_v35, %v468_v32  ;;  %v877_v60 = vmul.f32 %v477_v29, %v477_v29  ;;  %v759_v13 = vsel %vm659_vm1, %v477_v29, 0.0 }
  0xf2   :  { %v752_v41 = vadd.f32 %v751_v37, %v750_v31  ;;  %v949_v42 = vadd.f32 %v948_v39, %v947_v30  ;;  %v1197_v45 = vpop.f32.mrf.mxu0  ;;  %v1697_v52 = vpop.f32.mrf.mxu1  ;;  %v1708_v31 = vadd.f32 %v1453_v35, %v1576_v62 }
  0xf3   :  { %676 = vst.msk [vmem:[%s2167_s3 + $0x80] sm:$0xff] %vm659_vm1, %v469_v40  ;;  %v875_v48 = vmul.f32 %v469_v40, %v469_v40  ;;  %v480_v49 = vadd.f32 %v1197_v45, %v1453_v35  ;;  %v755_v58 = vsel %vm659_vm1, %v469_v40, 0.0  ;;  %v958_v22 = vsel %vm659_vm1, %v877_v60, 0.0 }
  0xf4   :  { %v951_v50 = vadd.f32 %v950_v46, %v949_v42  ;;  %v754_v51 = vadd.f32 %v753_v47, %v752_v41  ;;  %v471_v53 = vpop.f32.mrf.mxu0  ;;  %v1710_v32 = vpop.f32.mrf.mxu1  ;;  %700 = vst.msk [vmem:[%s2167_s3 + $0x140] sm:$0xff] %vm659_vm1, %v1708_v31 }
  0xf5   :  { %679 = vst.msk [vmem:[%s2167_s3 + $0x98] sm:$0xff] %vm659_vm1, %v480_v49  ;;  %v472_v59 = vadd.f32 %v1453_v35, %v471_v53  ;;  %v954_v2 = vsel %vm659_vm1, %v875_v48, 0.0  ;;  %v878_v14 = vmul.f32 %v480_v49, %v480_v49  ;;  %v761_v23 = vsel %vm659_vm1, %v480_v49, 0.0 }
  0xf6   :  { %v756_v63 = vadd.f32 %v755_v58, %v754_v51  ;;  %v953_v0 = vadd.f32 %v952_v57, %v951_v50  ;;  %v1200_v1 = vpop.f32.mrf.mxu0  ;;  %v1724_v62 = vpop.f32.mrf.mxu1  ;;  %v1735_v57 = vadd.f32 %v1590_v6, %v1453_v35 }
  0xf7   :  { %677 = vst.msk [vmem:[%s2167_s3 + $0x88] sm:$0xff] %vm659_vm1, %v472_v59  ;;  %v757_v3 = vsel %vm659_vm1, %v472_v59, 0.0  ;;  %v876_v4 = vmul.f32 %v472_v59, %v472_v59  ;;  %v493_v5 = vadd.f32 %v1200_v1, %v1453_v35  ;;  %v960_v37 = vsel %vm659_vm1, %v878_v14, 0.0 }
  0xf8   :  { %v955_v7 = vadd.f32 %v954_v2, %v953_v0  ;;  %v758_v9 = vadd.f32 %v757_v3, %v756_v63  ;;  %v484_v10 = vpop.f32.mrf.mxu0  ;;  %v1737_v58 = vpop.f32.mrf.mxu1  ;;  %703 = vst.msk [vmem:[%s2167_s3 + $0x158] sm:$0xff] %vm659_vm1, %v1735_v57 }
  0xf9   :  { %v956_v17 = vsel %vm659_vm1, %v876_v4, 0.0  ;;  %682 = vst.msk [vmem:[%s2167_s3 + $0xb0] sm:$0xff] %vm659_vm1, %v493_v5  ;;  %v485_v18 = vadd.f32 %v1453_v35, %v484_v10  ;;  %v881_v40 = vmul.f32 %v493_v5, %v493_v5  ;;  %v767_v59 = vsel %vm659_vm1, %v493_v5, 0.0 }
  0xfa   :  { %v760_v19 = vadd.f32 %v759_v13, %v758_v9  ;;  %v957_v20 = vadd.f32 %v956_v17, %v955_v7  ;;  %v1201_v21 = vpop.f32.mrf.mxu0  ;;  %v1751_v6 = vpop.f32.mrf.mxu1  ;;  %v1762_v17 = vadd.f32 %v1453_v35, %v1602_v16 }
  0xfb   :  { %680 = vst.msk [vmem:[%s2167_s3 + $0xa0] sm:$0xff] %vm659_vm1, %v485_v18  ;;  %v879_v26 = vmul.f32 %v485_v18, %v485_v18  ;;  %v496_v27 = vadd.f32 %v1201_v21, %v1453_v35  ;;  %v763_v38 = vsel %vm659_vm1, %v485_v18, 0.0  ;;  %v966_v4 = vsel %vm659_vm1, %v881_v40, 0.0 }
  0xfc   :  { %v959_v28 = vadd.f32 %v958_v22, %v957_v20  ;;  %v762_v29 = vadd.f32 %v761_v23, %v760_v19  ;;  %v487_v30 = vpop.f32.mrf.mxu0  ;;  %v1764_v18 = vpop.f32.mrf.mxu1  ;;  %701 = vst.msk [vmem:[%s2167_s3 + $0x148] sm:$0xff] %vm659_vm1, %v1762_v17 }
  0xfd   :  { %683 = vst.msk [vmem:[%s2167_s3 + $0xb8] sm:$0xff] %vm659_vm1, %v496_v27  ;;  %v488_v39 = vadd.f32 %v1453_v35, %v487_v30  ;;  %v962_v46 = vsel %vm659_vm1, %v879_v26, 0.0  ;;  %v882_v60 = vmul.f32 %v496_v27, %v496_v27  ;;  %v769_v5 = vsel %vm659_vm1, %v496_v27, 0.0 }
  0xfe   :  { %v764_v41 = vadd.f32 %v763_v38, %v762_v29  ;;  %v961_v42 = vadd.f32 %v960_v37, %v959_v28  ;;  %v1204_v45 = vpop.f32.mrf.mxu0  ;;  %v1778_v16 = vpop.f32.mrf.mxu1 }
  0xff   :  { %681 = vst.msk [vmem:[%s2167_s3 + $0xa8] sm:$0xff] %vm659_vm1, %v488_v39  ;;  %v765_v47 = vsel %vm659_vm1, %v488_v39, 0.0  ;;  %v880_v48 = vmul.f32 %v488_v39, %v488_v39  ;;  %v509_v49 = vadd.f32 %v1204_v45, %v1453_v35  ;;  %v968_v19 = vsel %vm659_vm1, %v882_v60, 0.0 }
 0x100   :  { %v963_v50 = vadd.f32 %v962_v46, %v961_v42  ;;  %v766_v51 = vadd.f32 %v765_v47, %v764_v41  ;;  %v500_v53 = vpop.f32.mrf.mxu0  ;;  %v1789_v41 = vadd.f32 %v1616_v24, %v1453_v35  ;;  %v1803_v24 = vpop.f32.mrf.mxu1 }
 0x101   :  { %v964_v63 = vsel %vm659_vm1, %v880_v48, 0.0  ;;  %686 = vst.msk [vmem:[%s2167_s3 + $0xd0] sm:$0xff] %vm659_vm1, %v509_v49  ;;  %v501_v0 = vadd.f32 %v1453_v35, %v500_v53  ;;  %v885_v22 = vmul.f32 %v509_v49, %v509_v49  ;;  %v775_v42 = vsel %vm659_vm1, %v509_v49, 0.0 }
 0x102   :  { %v768_v1 = vadd.f32 %v767_v59, %v766_v51  ;;  %v965_v2 = vadd.f32 %v964_v63, %v963_v50  ;;  %v1205_v3 = vpop.f32.mrf.mxu0  ;;  %706 = vst.msk [vmem:[%s2167_s3 + $0x170] sm:$0xff] %vm659_vm1, %v1789_v41 }
 0x103   :  { %684 = vst.msk [vmem:[%s2167_s3 + $0xc0] sm:$0xff] %vm659_vm1, %v501_v0  ;;  %v883_v7 = vmul.f32 %v501_v0, %v501_v0  ;;  %v512_v9 = vadd.f32 %v1205_v3, %v1453_v35  ;;  %v771_v20 = vsel %vm659_vm1, %v501_v0, 0.0  ;;  %v974_v49 = vsel %vm659_vm1, %v885_v22, 0.0 }
 0x104   :  { %v967_v10 = vadd.f32 %v966_v4, %v965_v2  ;;  %v770_v13 = vadd.f32 %v769_v5, %v768_v1  ;;  %v503_v14 = vpop.f32.mrf.mxu0  ;;  %v1814_v2 = vadd.f32 %v1453_v35, %v1629_v36  ;;  %v1828_v36 = vpop.f32.mrf.mxu1 }
 0x105   :  { %687 = vst.msk [vmem:[%s2167_s3 + $0xd8] sm:$0xff] %vm659_vm1, %v512_v9  ;;  %v504_v21 = vadd.f32 %v1453_v35, %v503_v14  ;;  %v970_v28 = vsel %vm659_vm1, %v883_v7, 0.0  ;;  %v886_v45 = vmul.f32 %v512_v9, %v512_v9  ;;  %v777_v53 = vsel %vm659_vm1, %v512_v9, 0.0 }
 0x106   :  { %v772_v23 = vadd.f32 %v771_v20, %v770_v13  ;;  %v969_v26 = vadd.f32 %v968_v19, %v967_v10  ;;  %v1208_v27 = vpop.f32.mrf.mxu0  ;;  %704 = vst.msk [vmem:[%s2167_s3 + $0x160] sm:$0xff] %vm659_vm1, %v1814_v2  ;;  %v1838_v20 = vadd.f32 %v1643_v34, %v1453_v35  ;;  %v1853_v34 = vadd.f32 %v1670_v44, %v1453_v35 }
 0x107   :  { %685 = vst.msk [vmem:[%s2167_s3 + $0xc8] sm:$0xff] %vm659_vm1, %v504_v21  ;;  %v773_v29 = vsel %vm659_vm1, %v504_v21, 0.0  ;;  %v884_v30 = vmul.f32 %v504_v21, %v504_v21  ;;  %v525_v37 = vadd.f32 %v1208_v27, %v1453_v35  ;;  %v976_v3 = vsel %vm659_vm1, %v886_v45, 0.0 }
 0x108   :  { %v971_v38 = vadd.f32 %v970_v28, %v969_v26  ;;  %v774_v39 = vadd.f32 %v773_v29, %v772_v23  ;;  %v516_v40 = vpop.f32.mrf.mxu0  ;;  %v1842_v23 = vadd.f32 %v1453_v35, %v1656_v56  ;;  %707 = vst.msk [vmem:[%s2167_s3 + $0x178] sm:$0xff] %vm659_vm1, %v1838_v20  ;;  %v631_v56 = vpop.f32.mrf.mxu1  ;;  %710 = vst.msk [vmem:[%s2167_s3 + $0x190] sm:$0xff] %vm659_vm1, %v1853_v34 }
 0x109   :  { %v972_v46 = vsel %vm659_vm1, %v884_v30, 0.0  ;;  %690 = vst.msk [vmem:[%s2167_s3 + $0xf0] sm:$0xff] %vm659_vm1, %v525_v37  ;;  %v517_v47 = vadd.f32 %v1453_v35, %v516_v40  ;;  %v889_v7 = vmul.f32 %v525_v37, %v525_v37  ;;  %v783_v26 = vsel %vm659_vm1, %v525_v37, 0.0 }
 0x10a   :  { %v776_v48 = vadd.f32 %v775_v42, %v774_v39  ;;  %v973_v50 = vadd.f32 %v972_v46, %v971_v38  ;;  %v1209_v51 = vpop.f32.mrf.mxu0  ;;  %705 = vst.msk [vmem:[%s2167_s3 + $0x168] sm:$0xff] %vm659_vm1, %v1842_v23  ;;  %v891_v39 = vmul.f32 %v1502_v8, %v1502_v8  ;;  %v1871_v44 = vadd.f32 %v1453_v35, %v1683_v12 }
 0x10b   :  { %688 = vst.msk [vmem:[%s2167_s3 + $0xe0] sm:$0xff] %vm659_vm1, %v517_v47  ;;  %v887_v59 = vmul.f32 %v517_v47, %v517_v47  ;;  %v528_v60 = vadd.f32 %v1209_v51, %v1453_v35  ;;  %v779_v4 = vsel %vm659_vm1, %v517_v47, 0.0  ;;  %v982_v37 = vsel %vm659_vm1, %v889_v7, 0.0 }
 0x10c   :  { %v975_v63 = vadd.f32 %v974_v49, %v973_v50  ;;  %v778_v0 = vadd.f32 %v777_v53, %v776_v48  ;;  %v519_v1 = vpop.f32.mrf.mxu0  ;;  %v1875_v45 = vadd.f32 %v1697_v52, %v1453_v35  ;;  %v787_v47 = vsel %vm659_vm1, %v1502_v8, 0.0  ;;  %708 = vst.msk [vmem:[%s2167_s3 + $0x180] sm:$0xff] %vm659_vm1, %v1871_v44  ;;  %v1240_v8 = vpop.f32.mrf.mxu1 }
 0x10d   :  { %691 = vst.msk [vmem:[%s2167_s3 + $0xf8] sm:$0xff] %vm659_vm1, %v528_v60  ;;  %v520_v5 = vadd.f32 %v1453_v35, %v519_v1  ;;  %v978_v13 = vsel %vm659_vm1, %v887_v59, 0.0  ;;  %v890_v27 = vmul.f32 %v528_v60, %v528_v60  ;;  %v785_v38 = vsel %vm659_vm1, %v528_v60, 0.0 }
 0x10e   :  { %v780_v9 = vadd.f32 %v779_v4, %v778_v0  ;;  %v977_v10 = vadd.f32 %v976_v3, %v975_v63  ;;  %v892_v48 = vmul.f32 %v1548_v43, %v1548_v43  ;;  %v1889_v12 = vadd.f32 %v1453_v35, %v1710_v32  ;;  %711 = vst.msk [vmem:[%s2167_s3 + $0x198] sm:$0xff] %vm659_vm1, %v1875_v45 }
 0x10f   :  { %689 = vst.msk [vmem:[%s2167_s3 + $0xe8] sm:$0xff] %vm659_vm1, %v520_v5  ;;  %v781_v14 = vsel %vm659_vm1, %v520_v5, 0.0  ;;  %v888_v19 = vmul.f32 %v520_v5, %v520_v5  ;;  %v984_v46 = vsel %vm659_vm1, %v890_v27, 0.0  ;;  %v893_v51 = vmul.f32 %v1480_v55, %v1480_v55 }
 0x110   :  { %v979_v21 = vadd.f32 %v978_v13, %v977_v10  ;;  %v782_v22 = vadd.f32 %v781_v14, %v780_v9  ;;  %v986_v49 = vsel %vm659_vm1, %v891_v39, 0.0  ;;  %v789_v53 = vsel %vm659_vm1, %v1548_v43, 0.0  ;;  %709 = vst.msk [vmem:[%s2167_s3 + $0x188] sm:$0xff] %vm659_vm1, %v1889_v12 }
 0x111   :  { %v980_v28 = vsel %vm659_vm1, %v888_v19, 0.0  ;;  %v1908_v32 = vadd.f32 %v1724_v62, %v1453_v35  ;;  %v1912_v63 = vadd.f32 %v1453_v35, %v1737_v58  ;;  %v791_v0 = vsel %vm659_vm1, %v1480_v55, 0.0  ;;  %v644_v55 = vpop.f32.mrf.mxu1 }
 0x112   :  { %v784_v29 = vadd.f32 %v783_v26, %v782_v22  ;;  %v981_v30 = vadd.f32 %v980_v28, %v979_v21  ;;  %v894_v43 = vmul.f32 %v1524_v25, %v1524_v25  ;;  %v988_v1 = vsel %vm659_vm1, %v892_v48, 0.0 }
 0x113   :  { %714 = vst.msk [vmem:[%s2167_s3 + $0x1b0] sm:$0xff] %vm659_vm1, %v1908_v32  ;;  %v1926_v62 = vadd.f32 %v1751_v6, %v1453_v35  ;;  %712 = vst.msk [vmem:[%s2167_s3 + $0x1a0] sm:$0xff] %vm659_vm1, %v1912_v63  ;;  %v990_v4 = vsel %vm659_vm1, %v893_v51, 0.0  ;;  %v793_v5 = vsel %vm659_vm1, %v1524_v25, 0.0  ;;  %v895_v7 = vmul.f32 %v1600_v15, %v1600_v15 }
 0x114   :  { %v983_v40 = vadd.f32 %v982_v37, %v981_v30  ;;  %v786_v42 = vadd.f32 %v785_v38, %v784_v29  ;;  %v1945_v6 = vadd.f32 %v1453_v35, %v1764_v18  ;;  %v1949_v13 = vadd.f32 %v1778_v16, %v1453_v35 }
 0x115   :  { %715 = vst.msk [vmem:[%s2167_s3 + $0x1b8] sm:$0xff] %vm659_vm1, %v1926_v62  ;;  %v992_v25 = vsel %vm659_vm1, %v894_v43, 0.0  ;;  %v795_v14 = vsel %vm659_vm1, %v1600_v15, 0.0  ;;  %v896_v19 = vmul.f32 %v1654_v54, %v1654_v54  ;;  %v1963_v18 = vadd.f32 %v1453_v35, %v1803_v24  ;;  %v1241_v15 = vpop.f32.mrf.mxu1 }
 0x116   :  { %v788_v52 = vadd.f32 %v787_v47, %v786_v42  ;;  %v985_v50 = vadd.f32 %v984_v46, %v983_v40  ;;  %713 = vst.msk [vmem:[%s2167_s3 + $0x1a8] sm:$0xff] %vm659_vm1, %v1945_v6  ;;  %718 = vst.msk [vmem:[%s2167_s3 + $0x1d0] sm:$0xff] %vm659_vm1, %v1949_v13  ;;  %v897_v22 = vmul.f32 %v1574_v61, %v1574_v61  ;;  %v994_v26 = vsel %vm659_vm1, %v895_v7, 0.0 }
 0x117   :  { %v797_v27 = vsel %vm659_vm1, %v1654_v54, 0.0  ;;  %716 = vst.msk [vmem:[%s2167_s3 + $0x1c0] sm:$0xff] %vm659_vm1, %v1963_v18  ;;  %v1982_v24 = vadd.f32 %v1828_v36, %v1453_v35  ;;  %v1985_v30 = vadd.f32 %v1453_v35, %v631_v56  ;;  %v799_v37 = vsel %vm659_vm1, %v1574_v61, 0.0  ;;  %v647_v61 = vpop.f32.mrf.mxu1 }
 0x118   :  { %v790_v59 = vadd.f32 %v789_v53, %v788_v52  ;;  %v987_v60 = vadd.f32 %v986_v49, %v985_v50  ;;  %v898_v54 = vmul.f32 %v1627_v33, %v1627_v33  ;;  %v996_v38 = vsel %vm659_vm1, %v896_v19, 0.0 }
 0x119   :  { %719 = vst.msk [vmem:[%s2167_s3 + $0x1d8] sm:$0xff] %vm659_vm1, %v1982_v24  ;;  %v1998_v36 = vadd.f32 %v1240_v8, %v1453_v35  ;;  %717 = vst.msk [vmem:[%s2167_s3 + $0x1c8] sm:$0xff] %vm659_vm1, %v1985_v30  ;;  %v998_v40 = vsel %vm659_vm1, %v897_v22, 0.0  ;;  %v801_v42 = vsel %vm659_vm1, %v1627_v33, 0.0  ;;  %v899_v46 = vmul.f32 %v1708_v31, %v1708_v31 }
 0x11a   :  { %v792_v58 = vadd.f32 %v791_v0, %v790_v59  ;;  %v989_v3 = vadd.f32 %v988_v1, %v987_v60  ;;  %v2016_v47 = vadd.f32 %v1453_v35, %v644_v55  ;;  %v2019_v50 = vadd.f32 %v1241_v15, %v1453_v35 }
 0x11b   :  { %722 = vst.msk [vmem:[%s2167_s3 + $0x1f0] sm:$0xff] %vm659_vm1, %v1998_v36  ;;  %v1000_v8 = vsel %vm659_vm1, %v898_v54, 0.0  ;;  %v803_v33 = vsel %vm659_vm1, %v1708_v31, 0.0  ;;  %v900_v51 = vmul.f32 %v1762_v17, %v1762_v17  ;;  %v2032_v49 = vadd.f32 %v1453_v35, %v647_v61 }
 0x11c   :  { %v991_v9 = vadd.f32 %v990_v4, %v989_v3  ;;  %v794_v10 = vadd.f32 %v793_v5, %v792_v58  ;;  %720 = vst.msk [vmem:[%s2167_s3 + $0x1e0] sm:$0xff] %vm659_vm1, %v2016_v47  ;;  %723 = vst.msk [vmem:[%s2167_s3 + $0x1f8] sm:$0xff] %vm659_vm1, %v2019_v50  ;;  %v901_v31 = vmul.f32 %v1681_v11, %v1681_v11  ;;  %v1002_v60 = vsel %vm659_vm1, %v899_v46, 0.0 }
 0x11d   :  { %v805_v0 = vsel %vm659_vm1, %v1762_v17, 0.0  ;;  %721 = vst.msk [vmem:[%s2167_s3 + $0x1e8] sm:$0xff] %vm659_vm1, %v2032_v49  ;;  %v807_v1 = vsel %vm659_vm1, %v1681_v11, 0.0  ;;  %v902_v58 = vmul.f32 %v1735_v57, %v1735_v57  ;;  %v1004_v3 = vsel %vm659_vm1, %v900_v51, 0.0 }
 0x11e   :  { %v796_v16 = vadd.f32 %v795_v14, %v794_v10  ;;  %v993_v21 = vadd.f32 %v992_v25, %v991_v9  ;;  %v1006_v17 = vsel %vm659_vm1, %v901_v31, 0.0  ;;  %v809_v5 = vsel %vm659_vm1, %v1735_v57, 0.0 }
 0x11f   :  { %v903_v7 = vmul.f32 %v1814_v2, %v1814_v2  ;;  %v1008_v25 = vsel %vm659_vm1, %v902_v58, 0.0  ;;  %v811_v11 = vsel %vm659_vm1, %v1814_v2, 0.0  ;;  %v904_v14 = vmul.f32 %v1842_v23, %v1842_v23 }
 0x120   :  { %v995_v28 = vadd.f32 %v994_v26, %v993_v21  ;;  %v798_v29 = vadd.f32 %v797_v27, %v796_v16  ;;  %v905_v21 = vmul.f32 %v1789_v41, %v1789_v41  ;;  %v813_v15 = vsel %vm659_vm1, %v1842_v23, 0.0 }
 0x121   :  { %v1010_v57 = vsel %vm659_vm1, %v903_v7, 0.0  ;;  %v815_v27 = vsel %vm659_vm1, %v1789_v41, 0.0  ;;  %v906_v2 = vmul.f32 %v1838_v20, %v1838_v20  ;;  %v907_v23 = vmul.f32 %v1871_v44, %v1871_v44 }
 0x122   :  { %v800_v39 = vadd.f32 %v799_v37, %v798_v29  ;;  %v997_v56 = vadd.f32 %v996_v38, %v995_v28  ;;  %v1012_v28 = vsel %vm659_vm1, %v904_v14, 0.0  ;;  %v1014_v54 = vsel %vm659_vm1, %v905_v21, 0.0 }
 0x123   :  { %v817_v38 = vsel %vm659_vm1, %v1838_v20, 0.0  ;;  %v1016_v61 = vsel %vm659_vm1, %v906_v2, 0.0  ;;  %v819_v41 = vsel %vm659_vm1, %v1871_v44, 0.0  ;;  %v1018_v20 = vsel %vm659_vm1, %v907_v23, 0.0 }
 0x124   :  { %v999_v48 = vadd.f32 %v998_v40, %v997_v56  ;;  %v802_v52 = vadd.f32 %v801_v42, %v800_v39  ;;  %v908_v40 = vmul.f32 %v1889_v12, %v1889_v12  ;;  %v823_v51 = vsel %vm659_vm1, %v1853_v34, 0.0 }
 0x125   :  { %v910_v44 = vmul.f32 %v1875_v45, %v1875_v45  ;;  %v912_v58 = vmul.f32 %v1945_v6, %v1945_v6  ;;  %v837_v2 = vsel %vm659_vm1, %v1985_v30, 0.0 }
 0x126   :  { %v804_v53 = vadd.f32 %v803_v33, %v802_v52  ;;  %v1001_v59 = vadd.f32 %v1000_v8, %v999_v48  ;;  %v909_v48 = vmul.f32 %v1853_v34, %v1853_v34  ;;  %v821_v52 = vsel %vm659_vm1, %v1889_v12, 0.0 }
 0x127   :  { %v911_v12 = vmul.f32 %v1912_v63, %v1912_v63  ;;  %v827_v34 = vsel %vm659_vm1, %v1912_v63, 0.0  ;;  %v914_v63 = vmul.f32 %v1926_v62, %v1926_v62 }
 0x128   :  { %v1003_v35 = vadd.f32 %v1002_v60, %v1001_v59  ;;  %v806_v43 = vadd.f32 %v805_v0, %v804_v53  ;;  %v1020_v53 = vsel %vm659_vm1, %v908_v40, 0.0  ;;  %v1022_v60 = vsel %vm659_vm1, %v909_v48, 0.0 }
 0x129   :  { %v825_v0 = vsel %vm659_vm1, %v1875_v45, 0.0  ;;  %v1026_v45 = vsel %vm659_vm1, %v911_v12, 0.0 }
 0x12a   :  { %v808_v55 = vadd.f32 %v807_v1, %v806_v43  ;;  %v1005_v4 = vadd.f32 %v1004_v3, %v1003_v35  ;;  %v1024_v1 = vsel %vm659_vm1, %v910_v44, 0.0 }
 0x12c   :  { %v1007_v9 = vadd.f32 %v1006_v17, %v1005_v4  ;;  %v810_v10 = vadd.f32 %v809_v5, %v808_v55  ;;  %v913_v4 = vmul.f32 %v1908_v32, %v1908_v32  ;;  %v829_v17 = vsel %vm659_vm1, %v1945_v6, 0.0 }
 0x12d   :  { %v915_v6 = vmul.f32 %v1963_v18, %v1963_v18 }
 0x12e   :  { %v812_v19 = vadd.f32 %v811_v11, %v810_v10  ;;  %v1009_v16 = vadd.f32 %v1008_v25, %v1007_v9  ;;  %v831_v9 = vsel %vm659_vm1, %v1908_v32, 0.0  ;;  %v1028_v10 = vsel %vm659_vm1, %v912_v58, 0.0 }
 0x12f   :  { %v1030_v14 = vsel %vm659_vm1, %v913_v4, 0.0  ;;  %v835_v32 = vsel %vm659_vm1, %v1963_v18, 0.0  ;;  %v918_v18 = vmul.f32 %v1982_v24, %v1982_v24 }
 0x130   :  { %v1011_v22 = vadd.f32 %v1010_v57, %v1009_v16  ;;  %v814_v26 = vadd.f32 %v813_v15, %v812_v19  ;;  %v833_v19 = vsel %vm659_vm1, %v1926_v62, 0.0  ;;  %v1032_v57 = vsel %vm659_vm1, %v914_v63, 0.0 }
 0x131   :  { %v916_v15 = vmul.f32 %v1985_v30, %v1985_v30  ;;  %v1034_v62 = vsel %vm659_vm1, %v915_v6, 0.0  ;;  %v919_v30 = vmul.f32 %v2016_v47, %v2016_v47  ;;  %v1040_v40 = vsel %vm659_vm1, %v918_v18, 0.0 }
 0x132   :  { %v816_v29 = vadd.f32 %v815_v27, %v814_v26  ;;  %v1013_v37 = vadd.f32 %v1012_v28, %v1011_v22  ;;  %v917_v27 = vmul.f32 %v1949_v13, %v1949_v13 }
 0x134   :  { %v1015_v39 = vadd.f32 %v1014_v54, %v1013_v37  ;;  %v818_v56 = vadd.f32 %v817_v38, %v816_v29  ;;  %v839_v37 = vsel %vm659_vm1, %v1949_v13, 0.0  ;;  %v1036_v54 = vsel %vm659_vm1, %v916_v15, 0.0 }
 0x135   :  { %v843_v13 = vsel %vm659_vm1, %v2016_v47, 0.0  ;;  %v922_v47 = vmul.f32 %v2019_v50, %v2019_v50 }
 0x136   :  { %v820_v42 = vadd.f32 %v819_v41, %v818_v56  ;;  %v1017_v46 = vadd.f32 %v1016_v61, %v1015_v39  ;;  %v1038_v39 = vsel %vm659_vm1, %v917_v27, 0.0  ;;  %v841_v56 = vsel %vm659_vm1, %v1982_v24, 0.0 }
 0x137   :  { %v1042_v24 = vsel %vm659_vm1, %v919_v30, 0.0 }
 0x138   :  { %v1019_v8 = vadd.f32 %v1018_v20, %v1017_v46  ;;  %v822_v33 = vadd.f32 %v821_v52, %v820_v42  ;;  %v920_v42 = vmul.f32 %v2032_v49, %v2032_v49  ;;  %v921_v20 = vmul.f32 %v1998_v36, %v1998_v36 }
 0x139   :  { %v845_v52 = vsel %vm659_vm1, %v2032_v49, 0.0  ;;  %v1048_v49 = vsel %vm659_vm1, %v922_v47, 0.0 }
 0x13a   :  { %v824_v59 = vadd.f32 %v823_v51, %v822_v33  ;;  %v1021_v31 = vadd.f32 %v1020_v53, %v1019_v8  ;;  %v847_v51 = vsel %vm659_vm1, %v1998_v36, 0.0  ;;  %v1044_v44 = vsel %vm659_vm1, %v920_v42, 0.0 }
 0x13c   :  { %v1023_v35 = vadd.f32 %v1022_v60, %v1021_v31  ;;  %v826_v43 = vadd.f32 %v825_v0, %v824_v59  ;;  %v1046_v31 = vsel %vm659_vm1, %v921_v20, 0.0  ;;  %v849_v60 = vsel %vm659_vm1, %v2019_v50, 0.0 }
 0x13e   :  { %v828_v3 = vadd.f32 %v827_v34, %v826_v43  ;;  %v1025_v55 = vadd.f32 %v1024_v1, %v1023_v35 }
 0x140   :  { %v1027_v5 = vadd.f32 %v1026_v45, %v1025_v55  ;;  %v830_v7 = vadd.f32 %v829_v17, %v828_v3 }
 0x142   :  { %v832_v25 = vadd.f32 %v831_v9, %v830_v7  ;;  %v1029_v11 = vadd.f32 %v1028_v10, %v1027_v5 }
 0x144   :  { %v1031_v16 = vadd.f32 %v1030_v14, %v1029_v11  ;;  %v834_v21 = vadd.f32 %v833_v19, %v832_v25 }
 0x146   :  { %v836_v22 = vadd.f32 %v835_v32, %v834_v21  ;;  %v1033_v26 = vadd.f32 %v1032_v57, %v1031_v16 }
 0x148   :  { %v1035_v28 = vadd.f32 %v1034_v62, %v1033_v26  ;;  %v838_v29 = vadd.f32 %v837_v2, %v836_v22 }
 0x14a   :  { %v840_v38 = vadd.f32 %v839_v37, %v838_v29  ;;  %v1037_v23 = vadd.f32 %v1036_v54, %v1035_v28 }
 0x14c   :  { %v1039_v61 = vadd.f32 %v1038_v39, %v1037_v23  ;;  %v842_v41 = vadd.f32 %v841_v56, %v840_v38 }
 0x14e   :  { %v844_v46 = vadd.f32 %v843_v13, %v842_v41  ;;  %v1041_v48 = vadd.f32 %v1040_v40, %v1039_v61 }
 0x150   :  { %v1043_v8 = vadd.f32 %v1042_v24, %v1041_v48  ;;  %v846_v33 = vadd.f32 %v845_v52, %v844_v46 }
 0x152   :  { %v848_v53 = vadd.f32 %v847_v51, %v846_v33  ;;  %v1045_v59 = vadd.f32 %v1044_v44, %v1043_v8 }
 0x154   :  { %v850_v0 = vadd.f32 %v849_v60, %v848_v53  ;;  %v1047_v12 = vadd.f32 %v1046_v31, %v1045_v59 }
 0x156   :  { %v851_v35 = vrot.slane %v850_v0, 4  ;;  %v1049_v43 = vadd.f32 %v1048_v49, %v1047_v12 }
 0x158   :  { %v852_v1 = vadd.f32 %v851_v35, %v850_v0  ;;  %v1050_v36 = vrot.slane %v1049_v43, 4 }
 0x15a   :  { %v853_v34 = vrot.slane %v852_v1, 2  ;;  %v1051_v58 = vadd.f32 %v1050_v36, %v1049_v43 }
 0x15c   :  { %v854_v3 = vadd.f32 %v853_v34, %v852_v1  ;;  %v1052_v55 = vrot.slane %v1051_v58, 2 }
 0x15e   :  { %v855_v4 = vrot.slane %v854_v3, 1  ;;  %v1053_v45 = vadd.f32 %v1052_v55, %v1051_v58 }
 0x160   :  { %v856_v17 = vadd.f32 %v855_v4, %v854_v3  ;;  %v1054_v5 = vrot.slane %v1053_v45, 1 }
 0x162   :  { %858 = vst.msk [vmem:[%s2168_s4] sm:$0x1] %vm857_vm2, %v856_v17  ;;  %v1055_v50 = vadd.f32 %v1054_v5, %v1053_v45 }
 0x164   :  { %1056 = vst.msk [vmem:[%s2169_s5] sm:$0x1] %vm857_vm2, %v1055_v50 }

</bundles_post_ra>
